<compile_context>
chip_gen: v7x
topology: tpu7x:2x2x1
jax: 0.10.0
libtpu: 0.0.40
codegen_flags: <defaults>
</compile_context>

<pallas_src>
import jax
import jax.numpy as jnp
from jax.experimental import pallas as pl
from jax.experimental.pallas import tpu as pltpu


def _cdiv(a, b):
    return -(-a // b)


def _round_up(n, m):
    return _cdiv(n, m) * m


# --------------------------------------------------------------------------- #
# Kernel: sigmoid(W2^T tanh(W1^T x + b1) + b2), fully transposed layout.
# --------------------------------------------------------------------------- #
def mlp_kernel(xT_ref, w1t_ref, b1t_ref, w2t_ref, b2t_ref, o_ref):
    # xT_ref : (in_size, tb) f32   -- batch on lanes
    # w1t_ref: (hid_p, in_size) f32
    # b1t_ref: (hid_p, 1) f32
    # w2t_ref: (out8, hid_p) bf16
    # b2t_ref: (out8, 1) f32
    # o_ref  : (out8, tb) store dtype (bf16 by default)
    xT = xT_ref[...]
    w1t = w1t_ref[...]
    in_size = xT.shape[0]

    if in_size <= 8:
        # Layer 1 on the VPU: K is tiny, so a couple of broadcast-FMAs beat a
        # >95%-empty MXU pass.  (hid_p,1) lane-broadcast x (1,tb) sublane-
        # broadcast is the same primitive class the v1 kernel compiled with.
        hT = w1t[:, 0:1] * xT[0:1, :]
        for k in range(1, in_size):
            hT = hT + w1t[:, k:k + 1] * xT[k:k + 1, :]
    else:
        # Fallback for larger in_size: canonical MXU matmul.
        hT = jnp.dot(w1t, xT, preferred_element_type=jnp.float32)

    hT = jnp.tanh(hT + b1t_ref[...])                       # (hid_p, tb) f32

    # Layer 2 on the MXU, canonical (out8, hid_p) x (hid_p, tb) form — output
    # is produced already-transposed, so no XLU transpose anywhere.
    zT = jnp.dot(w2t_ref[...], hT.astype(w2t_ref.dtype),
                 preferred_element_type=jnp.float32)        # (out8, tb) f32
    zT = zT + b2t_ref[...]                                  # band-only bias
    # sigmoid(x) = 0.5*(tanh(x/2)+1): one EUP tanh, band-only (tb/128 vregs).
    o_ref[...] = (0.5 * (jnp.tanh(0.5 * zT) + 1.0)).astype(o_ref.dtype)


# --------------------------------------------------------------------------- #
# One-time parameter preparation (hoisted out of the per-call forward path).
# --------------------------------------------------------------------------- #
def prepare_params(w1, b1, w2, b2):
    """Pack weights into the kernel's transposed, padded, lane/sublane-dense
    layout.  Call once; reuse the returned dict for every forward call."""
    in_size, hidden = w1.shape
    out_size = w2.shape[1]
    hid_p = _round_up(hidden, 128)          # hidden lives on sublanes (128 pad)
    out8 = _round_up(out_size, 8)           # output band padded to 8 sublanes

    w1t = jnp.zeros((hid_p, in_size), jnp.float32).at[:hidden, :].set(
        w1.astype(jnp.float32).T)
    b1t = jnp.zeros((hid_p, 1), jnp.float32).at[:hidden, 0].set(
        b1.reshape(-1).astype(jnp.float32))
    w2t = jnp.zeros((out8, hid_p), jnp.bfloat16).at[:out_size, :hidden].set(
        w2.astype(jnp.bfloat16).T)
    b2t = jnp.zeros((out8, 1), jnp.float32).at[:out_size, 0].set(
        b2.reshape(-1).astype(jnp.float32))
    return dict(w1t=w1t, b1t=b1t, w2t=w2t, b2t=b2t,
                in_size=in_size, hidden=hidden, out_size=out_size,
                hid_p=hid_p, out8=out8)


# --------------------------------------------------------------------------- #
# Batch tiling (batch lives on lanes -> tile must be a multiple of 128).
# --------------------------------------------------------------------------- #
def _choose_block_batch(B, bytes_per_col, tile_budget_bytes):
    """Return (tb, B_pad).  >=2 (ideally >=4) grid steps for big batches so
    v7x's 2 TensorCores and the DMA pipeline both get work; >=512 lanes/step
    when possible; never exceeds the per-step VMEM tile budget."""
    max_tb = (tile_budget_bytes // max(bytes_per_col, 1)) // 128 * 128
    max_tb = int(min(max(max_tb, 128), 4096))
    b128 = _round_up(B, 128)
    if b128 <= 512:                               # tiny batch: one dense tile
        tb = min(b128, max_tb)
        return tb, _round_up(B, tb)
    target = _round_up(_cdiv(b128, 4), 128)       # aim for >= 4 grid steps
    tb = max(min(max_tb, 2048, target), 512)      # but keep >= 512 lanes/step
    tb = min(tb, max_tb)                          # respect the VMEM budget
    tb = min(tb, _round_up(_cdiv(b128, 2), 128))  # and guarantee >= 2 steps
    tb = max(tb, 128)
    return tb, _round_up(B, tb)


# --------------------------------------------------------------------------- #
# Forward wrapper
# --------------------------------------------------------------------------- #
def nnet_multiclass_forward(x, params, *, block_batch=None,
                            store_dtype=jnp.bfloat16, out_dtype=jnp.float32):
    """Forward pass of NNet_multiclass: sigmoid(tanh(x @ W1 + b1) @ W2 + b2).

    x: (B, in_size).  `params` comes from prepare_params().  The kernel writes
    its lane-dense band in `store_dtype` (bf16 default halves HBM writeback);
    the returned (B, out_size) array is cast to `out_dtype` (f32 default,
    matching the PyTorch module)."""
    in_size = params["in_size"]
    out_size = params["out_size"]
    hid_p = params["hid_p"]
    out8 = params["out8"]
    B = x.shape[0]
    assert x.shape[1] == in_size

    store_itemsize = jnp.dtype(store_dtype).itemsize

    # Layout-accurate per-lane (per batch column) VMEM estimate:
    #   xT tile (sublane-padded to 8) + out tile, both double-buffered,
    #   plus the f32 hidden temporary, its bf16 copy and broadcast headroom.
    bytes_per_col = (2 * max(_round_up(in_size, 8), 8) * 4
                     + 2 * out8 * store_itemsize
                     + hid_p * 4 + hid_p * 2
                     + hid_p * 4)

    # Chip-aware VMEM ceiling (v7x has 64 MiB physical per TC, v5e/v6e 128 MiB).
    try:
        vmem_cap = int(pltpu.get_tpu_info().vmem_capacity_bytes)
    except Exception:
        vmem_cap = 64 * 1024 * 1024
    ceiling = max(16 * 1024 * 1024, min(48 * 1024 * 1024, vmem_cap // 2))
    tile_budget = ceiling // 2                     # leave room for weights/scratch

    if block_batch is None:
        tb, B_pad = _choose_block_batch(B, bytes_per_col, tile_budget)
    else:
        tb = int(block_batch)
        assert tb % 128 == 0, "block_batch must be a multiple of 128 (batch on lanes)"
        B_pad = _round_up(B, tb)

    # Resident, double-buffered weights (layout-padded sizes).
    weight_bytes = 2 * (hid_p * _round_up(in_size, 128) * 4      # w1t
                        + hid_p * 128 * 4                        # b1t
                        + _round_up(out8, 16) * hid_p * 2        # w2t (bf16)
                        + out8 * 128 * 4)                        # b2t
    vmem_limit = int(min(ceiling,
                         max(16 * 1024 * 1024,
                             2 * (tb * bytes_per_col + weight_bytes))))

    # Per-call input plumbing: transpose (tiny) + zero-pad batch to B_pad.
    xT = x.astype(jnp.float32).T                                  # (in_size, B)
    if B_pad != B:
        xT = jnp.pad(xT, ((0, 0), (0, B_pad - B)))

    grid = (B_pad // tb,)
    outT = pl.pallas_call(
        mlp_kernel,
        out_shape=jax.ShapeDtypeStruct((out8, B_pad), store_dtype),
        grid_spec=pltpu.PrefetchScalarGridSpec(
            num_scalar_prefetch=0,
            grid=grid,
            in_specs=[
                pl.BlockSpec((in_size, tb), lambda i: (0, i)),   # xT batch tile
                pl.BlockSpec((hid_p, in_size), lambda i: (0, 0)),  # W1ᵀ resident
                pl.BlockSpec((hid_p, 1), lambda i: (0, 0)),        # b1ᵀ resident
                pl.BlockSpec((out8, hid_p), lambda i: (0, 0)),     # W2ᵀ resident (bf16)
                pl.BlockSpec((out8, 1), lambda i: (0, 0)),         # b2ᵀ resident
            ],
            out_specs=pl.BlockSpec((out8, tb), lambda i: (0, i)),  # lane-dense band
        ),
        compiler_params=pltpu.CompilerParams(
            dimension_semantics=("parallel",),
            vmem_limit_bytes=vmem_limit,
        ),
    )(xT, params["w1t"], params["b1t"], params["w2t"], params["b2t"])

    # Strip sublane/batch padding, transpose back to (B, out_size).
    return outT[:out_size, :B].T.astype(out_dtype)


def init_params(key, in_size, hidden_size, out_size):
    """Deterministic init mimicking torch.nn.Linear default (U[-1/sqrt(fan_in), ...])."""
    k1, k2, k3, k4 = jax.random.split(key, 4)
    bound1 = 1.0 / jnp.sqrt(jnp.float32(in_size))
    bound2 = 1.0 / jnp.sqrt(jnp.float32(hidden_size))
    # stored transposed relative to PyTorch: (in, hidden) and (hidden, out)
    w1 = jax.random.uniform(k1, (in_size, hidden_size), jnp.float32, -bound1, bound1)
    b1 = jax.random.uniform(k2, (1, hidden_size), jnp.float32, -bound1, bound1)
    w2 = jax.random.uniform(k3, (hidden_size, out_size), jnp.float32, -bound2, bound2)
    b2 = jax.random.uniform(k4, (1, out_size), jnp.float32, -bound2, bound2)
    return w1, b1, w2, b2


if __name__ == "__main__":
    # Small shapes consistent with the module: 2 input features (dataset_simple.csv
    # uses X = df.iloc[:, 0:2]), hidden=32, 3 output classes, batch=8.
    batch, in_size, hidden_size, out_size = 8, 2, 32, 3

    key = jax.random.PRNGKey(0)
    kx, kp = jax.random.split(key)
    x = jax.random.normal(kx, (batch, in_size), dtype=jnp.float32)
    w1, b1, w2, b2 = init_params(kp, in_size, hidden_size, out_size)

    # One-time parameter packing (hoisted out of the steady-state forward path).
    params = prepare_params(w1, b1, w2, b2)

    out = nnet_multiclass_forward(x, params)
    out = jax.block_until_ready(out)

    # Pure-JAX f32 reference of the same forward semantics.  The kernel feeds
    # the second matmul bf16 operands (f32 accumulate) and stores the band in
    # bf16, so tolerance is kept loose.
    ref = jax.nn.sigmoid(jnp.tanh(x @ w1 + b1) @ w2 + b2)
    assert out.shape == (batch, out_size)
    assert out.dtype == jnp.float32
    assert jnp.allclose(out, ref, atol=2e-2, rtol=2e-2)

    print("KERNEL_OK")
</pallas_src>

<mosaic_0001>
module attributes {stable_mosaic.version = 11 : i64} {
  func.func @mlp_kernel(%arg0: i32, %arg1: memref<2x128xf32, #tpu.memory_space<vmem>>, %arg2: memref<128x2xf32, #tpu.memory_space<vmem>>, %arg3: memref<128x1xf32, #tpu.memory_space<vmem>>, %arg4: memref<8x128xbf16, #tpu.memory_space<vmem>>, %arg5: memref<8x1xf32, #tpu.memory_space<vmem>>, %arg6: memref<8x128xbf16, #tpu.memory_space<vmem>>) attributes {dimension_semantics = [#tpu.dimension_semantics<parallel>], iteration_bounds = array<i64: 1>, scalar_prefetch = 0 : i64, scratch_operands = 0 : i64, tpu.core_type = #tpu.core_type<tc>, window_params = [{transform_indices = @transform_0, window_bounds = array<i64: 2, 128>}, {pipeline_mode = #tpu.pipeline_mode<synchronous>, transform_indices = @transform_1, window_bounds = array<i64: 128, 2>}, {pipeline_mode = #tpu.pipeline_mode<synchronous>, transform_indices = @transform_2, window_bounds = array<i64: 128, 1>}, {pipeline_mode = #tpu.pipeline_mode<synchronous>, transform_indices = @transform_3, window_bounds = array<i64: 8, 128>}, {pipeline_mode = #tpu.pipeline_mode<synchronous>, transform_indices = @transform_4, window_bounds = array<i64: 8, 1>}, {transform_indices = @transform_5, window_bounds = array<i64: 8, 128>}]} {
    %c0 = arith.constant 0 : index
    %c0_0 = arith.constant 0 : index
    %0 = vector.load %arg1[%c0, %c0_0] : memref<2x128xf32, #tpu.memory_space<vmem>>, vector<2x128xf32>
    %c0_1 = arith.constant 0 : index
    %c0_2 = arith.constant 0 : index
    %1 = vector.load %arg2[%c0_1, %c0_2] : memref<128x2xf32, #tpu.memory_space<vmem>>, vector<128x2xf32>
    %2 = vector.extract_strided_slice %1 {offsets = [0, 0], sizes = [128, 1], strides = [1, 1]} : vector<128x2xf32> to vector<128x1xf32>
    %3 = vector.extract_strided_slice %0 {offsets = [0, 0], sizes = [1, 128], strides = [1, 1]} : vector<2x128xf32> to vector<1x128xf32>
    %4 = vector.broadcast %2 : vector<128x1xf32> to vector<128x128xf32>
    %5 = vector.broadcast %3 : vector<1x128xf32> to vector<128x128xf32>
    %6 = arith.mulf %4, %5 : vector<128x128xf32>
    %7 = vector.extract_strided_slice %1 {offsets = [0, 1], sizes = [128, 1], strides = [1, 1]} : vector<128x2xf32> to vector<128x1xf32>
    %8 = vector.extract_strided_slice %0 {offsets = [1, 0], sizes = [1, 128], strides = [1, 1]} : vector<2x128xf32> to vector<1x128xf32>
    %9 = vector.broadcast %7 : vector<128x1xf32> to vector<128x128xf32>
    %10 = vector.broadcast %8 : vector<1x128xf32> to vector<128x128xf32>
    %11 = arith.mulf %9, %10 : vector<128x128xf32>
    %12 = arith.addf %6, %11 : vector<128x128xf32>
    %c0_3 = arith.constant 0 : index
    %c0_4 = arith.constant 0 : index
    %13 = vector.load %arg3[%c0_3, %c0_4] : memref<128x1xf32, #tpu.memory_space<vmem>>, vector<128x1xf32>
    %14 = vector.broadcast %13 : vector<128x1xf32> to vector<128x128xf32>
    %15 = arith.addf %12, %14 : vector<128x128xf32>
    %16 = math.tanh %15 : vector<128x128xf32>
    %c0_5 = arith.constant 0 : index
    %c0_6 = arith.constant 0 : index
    %17 = vector.load %arg4[%c0_5, %c0_6] : memref<8x128xbf16, #tpu.memory_space<vmem>>, vector<8x128xbf16>
    %18 = arith.truncf %16 : vector<128x128xf32> to vector<128x128xbf16>
    %cst = arith.constant dense<0.000000e+00> : vector<8x128xf32>
    %19 = tpu.matmul %17, %18, %cst {dimension_numbers = #tpu.dot_dimension_numbers<[1], [0], [0], [1], [0, 0, 1, 1], [], []>} : vector<8x128xbf16>, vector<128x128xbf16>, vector<8x128xf32> -> vector<8x128xf32>
    %c0_7 = arith.constant 0 : index
    %c0_8 = arith.constant 0 : index
    %20 = vector.load %arg5[%c0_7, %c0_8] : memref<8x1xf32, #tpu.memory_space<vmem>>, vector<8x1xf32>
    %21 = vector.broadcast %20 : vector<8x1xf32> to vector<8x128xf32>
    %22 = arith.addf %19, %21 : vector<8x128xf32>
    %cst_9 = arith.constant 5.000000e-01 : f32
    %23 = vector.broadcast %cst_9 : f32 to vector<8x128xf32>
    %24 = arith.mulf %23, %22 : vector<8x128xf32>
    %25 = math.tanh %24 : vector<8x128xf32>
    %cst_10 = arith.constant 1.000000e+00 : f32
    %26 = vector.broadcast %cst_10 : f32 to vector<8x128xf32>
    %27 = arith.addf %25, %26 : vector<8x128xf32>
    %cst_11 = arith.constant 5.000000e-01 : f32
    %28 = vector.broadcast %cst_11 : f32 to vector<8x128xf32>
    %29 = arith.mulf %28, %27 : vector<8x128xf32>
    %30 = arith.truncf %29 : vector<8x128xf32> to vector<8x128xbf16>
    %c0_12 = arith.constant 0 : index
    %c0_13 = arith.constant 0 : index
    %31 = vector.load %arg6[%c0_12, %c0_13] : memref<8x128xbf16, #tpu.memory_space<vmem>>, vector<8x128xbf16>
    tpu.vector_store %arg6[%c0_12, %c0_13], %30 {strides = array<i32>} : memref<8x128xbf16, #tpu.memory_space<vmem>>, vector<8x128xbf16>,
    return
  }
  func.func @transform_0(%arg0: i32) -> (i32, i32) {
    %c0_i32 = arith.constant 0 : i32
    %c0_i32_0 = arith.constant 0 : i32
    return %c0_i32, %arg0 : i32, i32
  }
  func.func @transform_1(%arg0: i32) -> (i32, i32) {
    %c0_i32 = arith.constant 0 : i32
    %c0_i32_0 = arith.constant 0 : i32
    %c0_i32_1 = arith.constant 0 : i32
    return %c0_i32, %c0_i32_0 : i32, i32
  }
  func.func @transform_2(%arg0: i32) -> (i32, i32) {
    %c0_i32 = arith.constant 0 : i32
    %c0_i32_0 = arith.constant 0 : i32
    %c0_i32_1 = arith.constant 0 : i32
    return %c0_i32, %c0_i32_0 : i32, i32
  }
  func.func @transform_3(%arg0: i32) -> (i32, i32) {
    %c0_i32 = arith.constant 0 : i32
    %c0_i32_0 = arith.constant 0 : i32
    %c0_i32_1 = arith.constant 0 : i32
    return %c0_i32, %c0_i32_0 : i32, i32
  }
  func.func @transform_4(%arg0: i32) -> (i32, i32) {
    %c0_i32 = arith.constant 0 : i32
    %c0_i32_0 = arith.constant 0 : i32
    %c0_i32_1 = arith.constant 0 : i32
    return %c0_i32, %c0_i32_0 : i32, i32
  }
  func.func @transform_5(%arg0: i32) -> (i32, i32) {
    %c0_i32 = arith.constant 0 : i32
    %c0_i32_0 = arith.constant 0 : i32
    return %c0_i32, %arg0 : i32, i32
  }
}

</mosaic_0001>

<bundles_post_ra>
// kernel: tpu_custom_call.1
= control target key start
LH: loop header
LB: loop body
LE: loop exit
PB: predicated region body
PF: predicated region fallthrough
CT: control target
= control target key end

     0   :  { %v552_v2 = vmov 1   ;;  %v553_v7 = vmov 0   ;;  %s786_s0 = inlined_call_operand.vmem [shape: f32[2,128], index: 0, kind: input, shape index: {}]   ;;  %s787_s1 = inlined_call_operand.vmem [shape: f32[128,2], index: 1, kind: input, shape index: {}]   ;;  %s788_s2 = inlined_call_operand.vmem [shape: f32[128,1], index: 2, kind: input, shape index: {}]   ;;  %s789_s3 = inlined_call_operand.vmem [shape: bf16[8,128], index: 3, kind: input, shape index: {}]   ;;  %s790_s4 = inlined_call_operand.vmem [shape: f32[8,1], index: 4, kind: input, shape index: {}]   ;;  %s791_s5 = inlined_call_operand.hbm [shape: bf16[8,128], index: 5, kind: output, shape index: {}]  }
   0x1   :  { %v25_v0 = vld [vmem:[%s787_s1 + $0x10] sm:$0xff]  ;;  %v23_v1 = vld [vmem:[%s787_s1] sm:$0xff]  ;;  %478 = vset.pattern.permute.xlu0 %v552_v2  ;;  %476 = vset.pattern.permute.xlu1 %v552_v2  ;;  %v24_v4 = vld [vmem:[%s787_s1 + $0x8] sm:$0xff] }
   0x2   :  { %148 = vperm.xlu0 %478, %v25_v0   ;;  %140 = vperm.xlu1 %476, %v23_v1   ;;  %v27_v3 = vld [vmem:[%s787_s1 + $0x20] sm:$0xff]  ;;  %v29_v5 = vld [vmem:[%s787_s1 + $0x30] sm:$0xff]  ;;  %v26_v6 = vld [vmem:[%s787_s1 + $0x18] sm:$0xff] }
   0x3   :  { %v31_v8 = vld [vmem:[%s787_s1 + $0x40] sm:$0xff] }
   0x6   :  { %156 = vperm.xlu0 %478, %v27_v3   ;;  %144 = vperm.xlu1 %476, %v24_v4  }
   0xa   :  { %164 = vperm.xlu0 %478, %v29_v5   ;;  %477 = vset.pattern.permute.xlu1 %v553_v7 }
   0xb   :  { %56 = vperm.xlu1 %477, %v26_v6  }
   0xc   :  { %10 = vsyncpa [#allocation3], 0  ;;  %v33_v9 = vld [vmem:[%s787_s1 + $0x50] sm:$0xff]  ;;  %v239_v10 = vld [vmem:[%s788_s2] sm:$0xff]  ;;  %v554_v22 = vmov 0.0   ;;  %v119_v45 = vlaneseq  ;;  %vm555_vm0 = vmmov 0  }
   0xd   :  { %v35_v11 = vld [vmem:[%s787_s1 + $0x60] sm:$0xff]  ;;  %v625_v12 = vld [vmem:[%s787_s1 + $0x70] sm:$0xff]  ;;  %v28_v13 = vld [vmem:[%s787_s1 + $0x28] sm:$0xff]  ;;  %451 = vmatprep.subr.bf16.mxu0 %v554_v22  ;;  %467 = vmatprep.mubr.msk.bf16.mxu0 %vm555_vm0, %v554_v22  ;;  %s556_s9 = smov [#allocation2]  }
   0xe   :  { %172 = vperm.xlu0 %478, %v31_v8   ;;  %v241_v14 = vld [vmem:[%s788_s2 + $0x10] sm:$0xff]  ;;  %v240_v15 = vld [vmem:[%s788_s2 + $0x8] sm:$0xff]  ;;  %v242_v16 = vld [vmem:[%s788_s2 + $0x18] sm:$0xff]  ;;  %v120_v48 = vshrl.u32 %v119_v45, 7  ;;  %s434_s10 = sshll.u32 %s556_s9, 4  ;;  %s435_s10 = int_to_ptr.vmem [resolvable:$true] %s434_s10 }
   0xf   :  { %479 = vset.pattern.permute.xlu1 %v552_v2  ;;  %v30_v17 = vld [vmem:[%s787_s1 + $0x38] sm:$0xff]  ;;  %v244_v18 = vld [vmem:[%s788_s2 + $0x28] sm:$0xff]  ;;  %v243_v20 = vld [vmem:[%s788_s2 + $0x20] sm:$0xff]  ;;  %s528_s11 = scalar_lea.vmem %s435_s10, 64  ;;  %p533_p1 = scmp.lt.s32.totalorder %s435_s10, %s435_s10 }
  0x10   :  { %152 = vperm.xlu1 %479, %v26_v6   ;;  %v246_v19 = vld [vmem:[%s788_s2 + $0x38] sm:$0xff]  ;;  %v248_v21 = vld [vmem:[%s788_s2 + $0x48] sm:$0xff]  ;;  %v376_v26 = vld [vmem:[%s790_s4] sm:$0xff]  ;;  %v205_v51 = vsub.s32 1, %v120_v48  ;;  %v121_v52 = vsub.s32 0, %v120_v48  ;;  %p529_p0 = scmp.ne.s32.totalorder %s435_s10, %s528_s11  ;;  %p534_p2 = scmp.lt.s32.totalorder %s528_s11, %s528_s11 }
  0x11   :  { %v250_v23 = vld [vmem:[%s788_s2 + $0x58] sm:$0xff]  ;;  %v32_v24 = vld [vmem:[%s787_s1 + $0x48] sm:$0xff]  ;;  %v245_v27 = vld [vmem:[%s788_s2 + $0x30] sm:$0xff] }
  0x12   :  { %180 = vperm.xlu0 %478, %v33_v9   ;;  %v252_v25 = vld [vmem:[%s788_s2 + $0x68] sm:$0xff]  ;;  %v34_v28 = vld [vmem:[%s787_s1 + $0x58] sm:$0xff]  ;;  %v247_v29 = vld [vmem:[%s788_s2 + $0x40] sm:$0xff]  ;;  %p535_p3 = por %p534_p2, %p533_p1 }
  0x13   :  { %v36_v30 = vld [vmem:[%s787_s1 + $0x68] sm:$0xff]  ;;  %v249_v31 = vld [vmem:[%s788_s2 + $0x50] sm:$0xff]  ;;  %v38_v32 = vld [vmem:[%s787_s1 + $0x78] sm:$0xff] }
  0x14   :  { %480 = vset.pattern.permute.xlu1 %v553_v7  ;;  %v251_v33 = vld [vmem:[%s788_s2 + $0x60] sm:$0xff]  ;;  %v253_v36 = vld [vmem:[%s788_s2 + $0x70] sm:$0xff]  ;;  %v254_v39 = vld [vmem:[%s788_s2 + $0x78] sm:$0xff]  ;;  %p536_p4 = pnand %p535_p3, %p529_p0 }
  0x15   :  { %257 = vperm.xlu1 %480, %v239_v10   ;;  %v22_v53 = vld [vmem:[%s786_s0] sm:$0x3] }
  0x16   :  { %188 = vperm.xlu0 %478, %v35_v11   ;;  %v723_v56 = vrot.slane %v22_v53, %v205_v51  ;;  %v725_v57 = vrot.slane %v22_v53, %v121_v52 }
  0x19   :  { %61 = vperm.xlu1 %480, %v27_v3  }
  0x1a   :  { %196 = vperm.xlu0 %478, %v625_v12  }
  0x1d   :  { %66 = vperm.xlu1 %480, %v28_v13  }
  0x1e   :  { %491 = vset.pattern.permute.xlu0 %v553_v7 }
  0x1f   :  { %41 = vperm.xlu0 %491, %v23_v1  }
  0x21   :  { %481 = vset.pattern.permute.xlu1 %v552_v2 }
  0x22   :  { %160 = vperm.xlu1 %481, %v28_v13  }
  0x23   :  { %46 = vperm.xlu0 %491, %v24_v4  }
  0x26   :  { %482 = vset.pattern.permute.xlu1 %v553_v7 }
  0x27   :  { %51 = vperm.xlu0 %491, %v25_v0   ;;  %267 = vperm.xlu1 %482, %v241_v14  }
  0x2b   :  { %262 = vperm.xlu0 %491, %v240_v15   ;;  %71 = vperm.xlu1 %482, %v29_v5  }
  0x2f   :  { %272 = vperm.xlu0 %491, %v242_v16   ;;  %76 = vperm.xlu1 %482, %v30_v17  }
  0x33   :  { %282 = vperm.xlu0 %491, %v244_v18   ;;  %483 = vset.pattern.permute.xlu1 %v552_v2 }
  0x34   :  { %168 = vperm.xlu1 %483, %v30_v17  }
  0x37   :  { %292 = vperm.xlu0 %491, %v246_v19  }
  0x38   :  { %484 = vset.pattern.permute.xlu1 %v553_v7 }
  0x39   :  { %277 = vperm.xlu1 %484, %v243_v20  }
  0x3b   :  { %302 = vperm.xlu0 %491, %v248_v21  }
  0x3d   :  { %81 = vperm.xlu1 %484, %v31_v8  }
  0x3f   :  { %312 = vperm.xlu0 %491, %v250_v23  }
  0x41   :  { %86 = vperm.xlu1 %484, %v32_v24  }
  0x43   :  { %322 = vperm.xlu0 %491, %v252_v25  }
  0x45   :  { %485 = vset.pattern.permute.xlu1 %v552_v2 }
  0x46   :  { %176 = vperm.xlu1 %485, %v32_v24  }
  0x47   :  { %379 = vperm.xlu0 %491, %v376_v26  }
  0x4a   :  { %486 = vset.pattern.permute.xlu1 %v553_v7 }
  0x4b   :  { %287 = vperm.xlu1 %486, %v245_v27  }
  0x4f   :  { %91 = vperm.xlu1 %486, %v33_v9  }
  0x53   :  { %96 = vperm.xlu1 %486, %v34_v28  }
  0x57   :  { %487 = vset.pattern.permute.xlu1 %v552_v2 }
  0x58   :  { %184 = vperm.xlu1 %487, %v34_v28  }
  0x5c   :  { %488 = vset.pattern.permute.xlu1 %v553_v7 }
  0x5d   :  { %297 = vperm.xlu1 %488, %v247_v29  }
  0x61   :  { %101 = vperm.xlu1 %488, %v35_v11  }
  0x65   :  { %106 = vperm.xlu1 %488, %v36_v30  }
  0x69   :  { %489 = vset.pattern.permute.xlu1 %v552_v2 }
  0x6a   :  { %192 = vperm.xlu1 %489, %v36_v30  }
  0x6e   :  { %490 = vset.pattern.permute.xlu1 %v553_v7 }
  0x6f   :  { %307 = vperm.xlu1 %490, %v249_v31  }
  0x73   :  { %111 = vperm.xlu1 %490, %v625_v12  }
  0x77   :  { %116 = vperm.xlu1 %490, %v38_v32  }
  0x7b   :  { %492 = vset.pattern.permute.xlu1 %v552_v2 }
  0x7c   :  { %200 = vperm.xlu1 %492, %v38_v32  }
  0x80   :  { %493 = vset.pattern.permute.xlu1 %v553_v7 }
  0x81   :  { %317 = vperm.xlu1 %493, %v251_v33   ;;  %v141_v34 = vpop.permute.xlu1 %140  ;;  %v149_v35 = vpop.permute.xlu0 %148 }
  0x82   :  { %v207_v61 = vmul.f32 %v723_v56, %v141_v34  ;;  %v209_v62 = vmul.f32 %v723_v56, %v149_v35 }
  0x85   :  { %327 = vperm.xlu1 %493, %v253_v36   ;;  %v145_v37 = vpop.permute.xlu1 %144  ;;  %v157_v38 = vpop.permute.xlu0 %156 }
  0x86   :  { %v208_v3 = vmul.f32 %v723_v56, %v145_v37  ;;  %v211_v20 = vmul.f32 %v723_v56, %v157_v38 }
  0x89   :  { %332 = vperm.xlu1 %493, %v254_v39   ;;  %v709_v40 = vpop.permute.xlu0 %164 }
  0x8a   :  { %v57_v41 = vpop.permute.xlu1 %56 }
  0x8b   :  { %v126_v11 = vmul.f32 %v725_v57, %v57_v41 }
  0x8d   :  { %v711_v42 = vpop.permute.xlu0 %172 }
  0x8f   :  { %v153_v43 = vpop.permute.xlu1 %152 }
  0x90   :  { %v210_v5 = vmul.f32 %v723_v56, %v153_v43 }
  0x91   :  { %v713_v44 = vpop.permute.xlu0 %180 }
  0x92   :  { %v226_v14 = vadd.f32 %v210_v5, %v126_v11 }
  0x94   :  { %v258_v46 = vpop.permute.xlu1 %257 }
  0x95   :  { %v715_v47 = vpop.permute.xlu0 %188 }
  0x98   :  { %v62_v49 = vpop.permute.xlu1 %61 }
  0x99   :  { %v717_v50 = vpop.permute.xlu0 %196  ;;  %v127_v21 = vmul.f32 %v725_v57, %v62_v49 }
  0x9b   :  { %v227_v28 = vadd.f32 %v211_v20, %v127_v21 }
  0x9c   :  { %v67_v54 = vpop.permute.xlu1 %66 }
  0x9d   :  { %v128_v19 = vmul.f32 %v725_v57, %v67_v54 }
  0x9e   :  { %v42_v55 = vpop.permute.xlu0 %41 }
  0x9f   :  { %v123_v58 = vmul.f32 %v725_v57, %v42_v55 }
  0xa1   :  { %v161_v59 = vpop.permute.xlu1 %160  ;;  %v223_v63 = vadd.f32 %v207_v61, %v123_v58 }
  0xa2   :  { %v47_v60 = vpop.permute.xlu0 %46  ;;  %v212_v18 = vmul.f32 %v723_v56, %v161_v59 }
  0xa3   :  { %v124_v0 = vmul.f32 %v725_v57, %v47_v60  ;;  %v335_v6 = vadd.f32 %v258_v46, %v223_v63  ;;  %v213_v46 = vmul.f32 %v723_v56, %v709_v40 }
  0xa4   :  { %v228_v25 = vadd.f32 %v212_v18, %v128_v19  ;;  %v217_v19 = vmul.f32 %v723_v56, %v713_v44 }
  0xa5   :  { %v224_v8 = vadd.f32 %v208_v3, %v124_v0  ;;  %494 = vtanh.f32 %v335_v6 }
  0xa6   :  { %v52_v1 = vpop.permute.xlu0 %51  ;;  %v268_v2 = vpop.permute.xlu1 %267 }
  0xa7   :  { %v125_v4 = vmul.f32 %v725_v57, %v52_v1  ;;  %v215_v1 = vmul.f32 %v723_v56, %v711_v42 }
  0xa9   :  { %v225_v7 = vadd.f32 %v209_v62, %v125_v4 }
  0xaa   :  { %v263_v9 = vpop.permute.xlu0 %262  ;;  %v72_v10 = vpop.permute.xlu1 %71 }
  0xab   :  { %v336_v12 = vadd.f32 %v263_v9, %v224_v8  ;;  %v337_v13 = vadd.f32 %v268_v2, %v225_v7  ;;  %v129_v48 = vmul.f32 %v725_v57, %v72_v10 }
  0xad   :  { %496 = vtanh.f32 %v336_v12  ;;  %v229_v54 = vadd.f32 %v213_v46, %v129_v48 }
  0xae   :  { %v273_v15 = vpop.permute.xlu0 %272  ;;  %v77_v16 = vpop.permute.xlu1 %76  ;;  %498 = vtanh.f32 %v337_v13 }
  0xaf   :  { %v338_v17 = vadd.f32 %v273_v15, %v226_v14  ;;  %v495_v27 = vpop.eup %494  ;;  %v130_v39 = vmul.f32 %v725_v57, %v77_v16 }
  0xb1   :  { %500 = vtanh.f32 %v338_v17 }
  0xb2   :  { %v283_v23 = vpop.permute.xlu0 %282 }
  0xb3   :  { %v169_v24 = vpop.permute.xlu1 %168  ;;  %v340_v26 = vadd.f32 %v283_v23, %v228_v25 }
  0xb4   :  { %v214_v37 = vmul.f32 %v723_v56, %v169_v24 }
  0xb5   :  { %502 = vtanh.f32 %v340_v26 }
  0xb6   :  { %v230_v43 = vadd.f32 %v214_v37, %v130_v39  ;;  %v293_v49 = vpop.permute.xlu0 %292 }
  0xb7   :  { %v497_v29 = vpop.eup %496 }
  0xb8   :  { %v278_v30 = vpop.permute.xlu1 %277  ;;  %v368_v32 = vpack.c.bf16 %v497_v29, %v495_v27  ;;  %v499_v33 = vpop.eup %498  ;;  %v342_v53 = vadd.f32 %v293_v49, %v230_v43 }
  0xb9   :  { %v339_v31 = vadd.f32 %v278_v30, %v227_v28 }
  0xba   :  { %452 = vmatpush3.bf16.msra.mxu0 %v368_v32  ;;  %v303_v3 = vpop.permute.xlu0 %302 }
  0xbb   :  { %v501_v34 = vpop.eup %500  ;;  %504 = vtanh.f32 %v339_v31  ;;  %453 = vmatprep.subr.bf16.mxu0 %v554_v22 }
  0xbc   :  { %v82_v35 = vpop.permute.xlu1 %81  ;;  %v369_v36 = vpack.c.bf16 %v501_v34, %v499_v33  ;;  %506 = vtanh.f32 %v342_v53 }
  0xbd   :  { %v131_v2 = vmul.f32 %v725_v57, %v82_v35  ;;  %v219_v35 = vmul.f32 %v723_v56, %v715_v47 }
  0xbe   :  { %454 = vmatpush3.bf16.msra.mxu0 %v369_v36  ;;  %v313_v20 = vpop.permute.xlu0 %312 }
  0xbf   :  { %455 = vmatprep.subr.bf16.mxu0 %v554_v22  ;;  %v503_v41 = vpop.eup %502  ;;  %v231_v7 = vadd.f32 %v215_v1, %v131_v2 }
  0xc0   :  { %v87_v38 = vpop.permute.xlu1 %86 }
  0xc1   :  { %v132_v40 = vmul.f32 %v725_v57, %v87_v38 }
  0xc2   :  { %v323_v36 = vpop.permute.xlu0 %322 }
  0xc5   :  { %v505_v45 = vpop.eup %504  ;;  %v177_v51 = vpop.permute.xlu1 %176 }
  0xc6   :  { %v370_v52 = vpack.c.bf16 %v503_v41, %v505_v45  ;;  %v216_v60 = vmul.f32 %v723_v56, %v177_v51  ;;  %v507_v62 = vpop.eup %506  ;;  %v221_v45 = vmul.f32 %v723_v56, %v717_v50 }
  0xc8   :  { %456 = vmatpush3.bf16.msra.mxu0 %v370_v52  ;;  %v232_v63 = vadd.f32 %v216_v60, %v132_v40 }
  0xc9   :  { %457 = vmatprep.subr.bf16.mxu0 %v554_v22 }
  0xca   :  { %v288_v55 = vpop.permute.xlu1 %287  ;;  %v344_v6 = vadd.f32 %v303_v3, %v232_v63 }
  0xcb   :  { %v341_v58 = vadd.f32 %v288_v55, %v229_v54 }
  0xcd   :  { %508 = vtanh.f32 %v341_v58 }
  0xce   :  { %v92_v59 = vpop.permute.xlu1 %91  ;;  %510 = vtanh.f32 %v344_v6 }
  0xcf   :  { %v133_v16 = vmul.f32 %v725_v57, %v92_v59 }
  0xd1   :  { %v233_v23 = vadd.f32 %v217_v19, %v133_v16 }
  0xd2   :  { %v97_v61 = vpop.permute.xlu1 %96 }
  0xd3   :  { %v134_v42 = vmul.f32 %v725_v57, %v97_v61  ;;  %v380_v61 = vpop.permute.xlu0 %379 }
  0xd7   :  { %v509_v0 = vpop.eup %508  ;;  %v185_v4 = vpop.permute.xlu1 %184 }
  0xd8   :  { %v371_v5 = vpack.c.bf16 %v507_v62, %v509_v0  ;;  %v218_v11 = vmul.f32 %v723_v56, %v185_v4  ;;  %v511_v13 = vpop.eup %510 }
  0xda   :  { %458 = vmatpush3.bf16.msra.mxu0 %v371_v5  ;;  %v234_v14 = vadd.f32 %v218_v11, %v134_v42 }
  0xdb   :  { %459 = vmatprep.subr.bf16.mxu0 %v554_v22 }
  0xdc   :  { %v298_v8 = vpop.permute.xlu1 %297  ;;  %v346_v21 = vadd.f32 %v313_v20, %v234_v14 }
  0xdd   :  { %v343_v9 = vadd.f32 %v298_v8, %v231_v7 }
  0xdf   :  { %512 = vtanh.f32 %v343_v9 }
  0xe0   :  { %v102_v10 = vpop.permute.xlu1 %101  ;;  %514 = vtanh.f32 %v346_v21 }
  0xe1   :  { %v135_v44 = vmul.f32 %v725_v57, %v102_v10 }
  0xe3   :  { %v235_v38 = vadd.f32 %v219_v35, %v135_v44 }
  0xe4   :  { %v107_v12 = vpop.permute.xlu1 %106 }
  0xe5   :  { %v136_v29 = vmul.f32 %v725_v57, %v107_v12 }
  0xe9   :  { %v513_v15 = vpop.eup %512  ;;  %v193_v17 = vpop.permute.xlu1 %192 }
  0xea   :  { %v372_v18 = vpack.c.bf16 %v511_v13, %v513_v15  ;;  %v220_v27 = vmul.f32 %v723_v56, %v193_v17  ;;  %v515_v30 = vpop.eup %514 }
  0xec   :  { %460 = vmatpush3.bf16.msra.mxu0 %v372_v18  ;;  %v236_v31 = vadd.f32 %v220_v27, %v136_v29 }
  0xed   :  { %461 = vmatprep.subr.bf16.mxu0 %v554_v22 }
  0xee   :  { %v308_v24 = vpop.permute.xlu1 %307  ;;  %v348_v37 = vadd.f32 %v323_v36, %v236_v31 }
  0xef   :  { %v345_v25 = vadd.f32 %v308_v24, %v233_v23 }
  0xf1   :  { %516 = vtanh.f32 %v345_v25 }
  0xf2   :  { %v112_v26 = vpop.permute.xlu1 %111  ;;  %518 = vtanh.f32 %v348_v37 }
  0xf3   :  { %v137_v39 = vmul.f32 %v725_v57, %v112_v26 }
  0xf5   :  { %v237_v49 = vadd.f32 %v221_v45, %v137_v39 }
  0xf6   :  { %v117_v28 = vpop.permute.xlu1 %116 }
  0xf7   :  { %v138_v47 = vmul.f32 %v725_v57, %v117_v28  ;;  %v367_v57 = vld [vmem:[%s789_s3] sm:$0xf] }
  0xfb   :  { %v517_v32 = vpop.eup %516  ;;  %v201_v33 = vpop.permute.xlu1 %200 }
  0xfc   :  { %v373_v34 = vpack.c.bf16 %v515_v30, %v517_v32  ;;  %v222_v46 = vmul.f32 %v723_v56, %v201_v33  ;;  %v519_v55 = vpop.eup %518 }
  0xfe   :  { %462 = vmatpush3.bf16.msra.mxu0 %v373_v34  ;;  %v238_v52 = vadd.f32 %v222_v46, %v138_v47 }
  0xff   :  { %463 = vmatprep.subr.bf16.mxu0 %v554_v22 }
 0x100   :  { %v318_v41 = vpop.permute.xlu1 %317 }
 0x101   :  { %v347_v43 = vadd.f32 %v318_v41, %v235_v38 }
 0x103   :  { %520 = vtanh.f32 %v347_v43 }
 0x104   :  { %v328_v48 = vpop.permute.xlu1 %327 }
 0x105   :  { %v349_v51 = vadd.f32 %v328_v48, %v237_v49 }
 0x107   :  { %522 = vtanh.f32 %v349_v51 }
 0x108   :  { %v333_v53 = vpop.permute.xlu1 %332 }
 0x109   :  { %v350_v54 = vadd.f32 %v333_v53, %v238_v52 }
 0x10b   :  { %524 = vtanh.f32 %v350_v54 }
 0x10d   :  { %v521_v58 = vpop.eup %520 }
 0x10e   :  { %v374_v59 = vpack.c.bf16 %v519_v55, %v521_v58 }
 0x110   :  { %464 = vmatpush3.bf16.msra.mxu0 %v374_v59 }
 0x111   :  { %465 = vmatprep.subr.bf16.mxu0 %v554_v22  ;;  %v523_v50 = vpop.eup %522 }
 0x115   :  { %v525_v60 = vpop.eup %524 }
 0x116   :  { %v375_v56 = vpack.c.bf16 %v525_v60, %v523_v50 }
 0x118   :  { %466 = vmatpush3.bf16.msra.mxu0 %v375_v56 }
 0x11b   :  { %468 = vmatmul.mubr.bf16.vlgmr.msra.gmra.mrb[0].mxu0 %v367_v57 }
 0x1ee   :  { %v416_v40 = vpop.f32.mrb[0].mxu0 }
 0x1ef   :  { %v417_v62 = vadd.f32 %v416_v40, %v380_v61  ;;  %v469_v63 = vpop.f32.mrb[1].mxu0 }
 0x1f0   :  { %v419_v0 = vpop.f32.mrb[2].mxu0 }
 0x1f1   :  { %v422_v1 = vmul.f32 0.5, %v417_v62  ;;  %v470_v2 = vpop.f32.mrb[3].mxu0 }
 0x1f3   :  { %526 = vtanh.f32 %v422_v1 }
 0x1fd   :  { %v527_v3 = vpop.eup %526 }
 0x1fe   :  { %v424_v4 = vadd.f32 1.0, %v527_v3 }
 0x200   :  { %v425_v22 = vmul.f32 0.5, %v424_v4 }
 0x202   :  { %v426_v5 = vpack.c.bf16 %v425_v22, %v425_v22 }
 0x204   :  { %427 = vst [vmem:[#allocation2] sm:$0xf] %v426_v5 }
 0x205   :  { %539 = shalt.err (!%p536_p4)
}
 0x206   :  { %s540_s13 = scalar_lea.hbm %s791_s5, 64 }
 0x207   :  { %p541_p5 = scmp.ne.s32.totalorder %s791_s5, %s540_s13  ;;  %p544_p6 = scmp.lt.u32.totalorder %s540_s13, %s791_s5 }
 0x209   :  { %p546_p7 = pnand %p544_p6, %p541_p5 }
 0x20b   :  { %549 = shalt.err (!%p546_p7)
}
 0x20c   :  { %437 = dma.vmem_to_hbm [thread:$0]  %s435_s10, 64, %s791_s5, [#allocation3]  }
 0x20d   :  { %550 = dma.done.wait [#allocation3], 64  }
 0x20e   :  { %551 = vsyncadd [#allocation3], 4294967232 }
 0x20f   :  { %441 = vsyncpa [#allocation3], 1 }

</bundles_post_ra>
